<compile_context>
chip_gen: v7x
topology: tpu7x:2x2x1
jax: 0.10.0
libtpu: 0.0.40
codegen_flags: <defaults>
</compile_context>

<pallas_src>
import jax
import jax.numpy as jnp
from jax.experimental import pallas as pl
from jax.experimental.pallas import tpu as pltpu

EPS = 1e-5
LANES = 128
SUBLANES = 8
MAX_TILE_ROWS = 4096  # 4096 * 128 * 4B = 2 MiB per f32 input block


def _dice_loss_kernel(pred_ref, gt_ref, out_ref, tp_acc, sp_acc, sg_acc):
    r = pl.program_id(1)

    @pl.when(r == 0)
    def _():
        tp_acc[...] = jnp.zeros_like(tp_acc)
        sp_acc[...] = jnp.zeros_like(sp_acc)
        sg_acc[...] = jnp.zeros_like(sg_acc)

    p = pred_ref[...].astype(jnp.float32)  # (tile_rows, 128)
    g = gt_ref[...].astype(jnp.float32)

    rows = p.shape[0]
    p3 = p.reshape(rows // SUBLANES, SUBLANES, LANES)
    g3 = g.reshape(rows // SUBLANES, SUBLANES, LANES)

    # Lane/sublane-wide partial sums: vreg-wise VPU adds only in the hot loop,
    # hidden under the streaming DMA.
    tp_acc[...] += jnp.sum(g3 * p3, axis=0)
    sp_acc[...] += jnp.sum(p3, axis=0)
    sg_acc[...] += jnp.sum(g3, axis=0)

    @pl.when(r == pl.num_programs(1) - 1)
    def _():
        # One cross-sublane/cross-lane reduce per sample, only at the end.
        tp = jnp.sum(tp_acc[...])
        sp = jnp.sum(sp_acc[...])
        sg = jnp.sum(sg_acc[...])
        # 2*tp + fp + fn == sum(pred) + sum(gt)
        dice = (2.0 * tp + EPS) / (sp + sg + EPS)
        out_ref[...] = jnp.full(out_ref.shape, dice, dtype=out_ref.dtype)


def dice_loss(y_pr: jax.Array, y_gt: jax.Array) -> jax.Array:
    """Pallas DiceLoss forward. Inputs: (N, ...). Returns scalar f32."""
    assert y_pr.shape == y_gt.shape
    N = y_pr.shape[0]
    D = 1
    for s in y_pr.shape[1:]:
        D *= s

    # Feature layout: pad D up to a multiple of (tile_rows * 128) with zeros
    # (neutral for all three sums), then view each sample as (rows, 128).
    rows_raw = -(-D // LANES)  # ceil(D / 128)
    if rows_raw >= MAX_TILE_ROWS:
        tile_rows = MAX_TILE_ROWS
    else:
        tile_rows = -(-rows_raw // SUBLANES) * SUBLANES  # round up to 8
    rows_pad = -(-rows_raw // tile_rows) * tile_rows
    d_pad = rows_pad * LANES

    pred2d = y_pr.reshape(N, D)
    gt2d = y_gt.reshape(N, D)
    if d_pad != D:
        pad = ((0, 0), (0, d_pad - D))
        pred2d = jnp.pad(pred2d, pad)
        gt2d = jnp.pad(gt2d, pad)
    pred3d = pred2d.reshape(N, rows_pad, LANES)
    gt3d = gt2d.reshape(N, rows_pad, LANES)

    grid = (N, rows_pad // tile_rows)

    dice = pl.pallas_call(
        _dice_loss_kernel,
        out_shape=jax.ShapeDtypeStruct((N, SUBLANES, LANES), jnp.float32),
        grid_spec=pltpu.PrefetchScalarGridSpec(
            num_scalar_prefetch=0,
            grid=grid,
            in_specs=[
                pl.BlockSpec((None, tile_rows, LANES), lambda n, r: (n, r, 0)),
                pl.BlockSpec((None, tile_rows, LANES), lambda n, r: (n, r, 0)),
            ],
            out_specs=pl.BlockSpec(
                (None, SUBLANES, LANES), lambda n, r: (n, 0, 0)
            ),
            scratch_shapes=[
                pltpu.VMEM((SUBLANES, LANES), jnp.float32),  # tp accumulator
                pltpu.VMEM((SUBLANES, LANES), jnp.float32),  # sum(pred) acc
                pltpu.VMEM((SUBLANES, LANES), jnp.float32),  # sum(gt) acc
            ],
        ),
        compiler_params=pltpu.CompilerParams(
            dimension_semantics=("parallel", "arbitrary"),
        ),
    )(pred3d, gt3d)

    dice_per_sample = dice[:, 0, 0]  # (N,)
    return 1.0 - jnp.sum(dice_per_sample) / N


def dice_loss_ref(y_pr, y_gt, eps=EPS):
    """Pure-JAX reference matching diceCoeffv2 / DiceLoss."""
    n = y_pr.shape[0]
    p = y_pr.reshape(n, -1).astype(jnp.float32)
    g = y_gt.reshape(n, -1).astype(jnp.float32)
    tp = jnp.sum(g * p, axis=1)
    fp = jnp.sum(p, axis=1) - tp
    fn = jnp.sum(g, axis=1) - tp
    dice = (2 * tp + eps) / (2 * tp + fp + fn + eps)
    return 1.0 - jnp.sum(dice) / n


if __name__ == "__main__":
    key = jax.random.PRNGKey(0)
    k1, k2, k3, k4 = jax.random.split(key, 4)

    # Case 1: small NCHW, D is already a multiple of 128 (no padding path).
    shape = (2, 4, 16, 16)
    y_pr = jax.nn.sigmoid(jax.random.normal(k1, shape, dtype=jnp.float32))
    y_gt = (jax.random.uniform(k2, shape, dtype=jnp.float32) > 0.5).astype(
        jnp.float32
    )
    loss = jax.block_until_ready(dice_loss(y_pr, y_gt))
    ref = jax.block_until_ready(dice_loss_ref(y_pr, y_gt))
    assert jnp.allclose(loss, ref, atol=1e-5, rtol=1e-5), (loss, ref)

    # Case 2: odd D (exercises the zero-padding path).
    shape2 = (2, 3, 10, 10)
    y_pr2 = jax.nn.sigmoid(jax.random.normal(k3, shape2, dtype=jnp.float32))
    y_gt2 = (jax.random.uniform(k4, shape2, dtype=jnp.float32) > 0.5).astype(
        jnp.float32
    )
    loss2 = jax.block_until_ready(dice_loss(y_pr2, y_gt2))
    ref2 = jax.block_until_ready(dice_loss_ref(y_pr2, y_gt2))
    assert jnp.allclose(loss2, ref2, atol=1e-5, rtol=1e-5), (loss2, ref2)

    print("KERNEL_OK")
</pallas_src>

<mosaic_0001>
module attributes {stable_mosaic.version = 11 : i64} {
  func.func @_dice_loss_kernel(%arg0: i32, %arg1: i32, %arg2: memref<1x8x128xf32, #tpu.memory_space<vmem>>, %arg3: memref<1x8x128xf32, #tpu.memory_space<vmem>>, %arg4: memref<1x8x128xf32, #tpu.memory_space<vmem>>, %arg5: memref<8x128xf32, #tpu.memory_space<vmem>>, %arg6: memref<8x128xf32, #tpu.memory_space<vmem>>, %arg7: memref<8x128xf32, #tpu.memory_space<vmem>>) attributes {dimension_semantics = [#tpu.dimension_semantics<parallel>, #tpu.dimension_semantics<arbitrary>], iteration_bounds = array<i64: 2, 1>, scalar_prefetch = 0 : i64, scratch_operands = 3 : i64, tpu.core_type = #tpu.core_type<tc>, window_params = [{transform_indices = @transform_0, window_bounds = array<i64: 1, 8, 128>}, {transform_indices = @transform_1, window_bounds = array<i64: 1, 8, 128>}, {transform_indices = @transform_2, window_bounds = array<i64: 1, 8, 128>}]} {
    %c0_i32 = arith.constant 0 : i32
    %0 = arith.cmpi eq, %arg1, %c0_i32 : i32
    %1 = arith.extui %0 : i1 to i32
    %c0_i32_0 = arith.constant 0 : i32
    %2 = arith.cmpi ne, %1, %c0_i32_0 : i32
    scf.if %2 {
      %cst_22 = arith.constant 0.000000e+00 : f32
      %25 = vector.broadcast %cst_22 : f32 to vector<8x128xf32>
      %c0_23 = arith.constant 0 : index
      %c0_24 = arith.constant 0 : index
      %26 = vector.load %arg5[%c0_23, %c0_24] : memref<8x128xf32, #tpu.memory_space<vmem>>, vector<8x128xf32>
      tpu.vector_store %arg5[%c0_23, %c0_24], %25 {strides = array<i32>} : memref<8x128xf32, #tpu.memory_space<vmem>>, vector<8x128xf32>,
      %cst_25 = arith.constant 0.000000e+00 : f32
      %27 = vector.broadcast %cst_25 : f32 to vector<8x128xf32>
      %c0_26 = arith.constant 0 : index
      %c0_27 = arith.constant 0 : index
      %28 = vector.load %arg6[%c0_26, %c0_27] : memref<8x128xf32, #tpu.memory_space<vmem>>, vector<8x128xf32>
      tpu.vector_store %arg6[%c0_26, %c0_27], %27 {strides = array<i32>} : memref<8x128xf32, #tpu.memory_space<vmem>>, vector<8x128xf32>,
      %cst_28 = arith.constant 0.000000e+00 : f32
      %29 = vector.broadcast %cst_28 : f32 to vector<8x128xf32>
      %c0_29 = arith.constant 0 : index
      %c0_30 = arith.constant 0 : index
      %30 = vector.load %arg7[%c0_29, %c0_30] : memref<8x128xf32, #tpu.memory_space<vmem>>, vector<8x128xf32>
      tpu.vector_store %arg7[%c0_29, %c0_30], %29 {strides = array<i32>} : memref<8x128xf32, #tpu.memory_space<vmem>>, vector<8x128xf32>,
    } else {
    }
    %c0 = arith.constant 0 : index
    %c0_1 = arith.constant 0 : index
    %c0_2 = arith.constant 0 : index
    %3 = vector.load %arg2[%c0, %c0_1, %c0_2] : memref<1x8x128xf32, #tpu.memory_space<vmem>>, vector<1x8x128xf32>
    %4 = vector.shape_cast %3 : vector<1x8x128xf32> to vector<8x128xf32>
    %c0_3 = arith.constant 0 : index
    %c0_4 = arith.constant 0 : index
    %c0_5 = arith.constant 0 : index
    %5 = vector.load %arg3[%c0_3, %c0_4, %c0_5] : memref<1x8x128xf32, #tpu.memory_space<vmem>>, vector<1x8x128xf32>
    %6 = vector.shape_cast %5 : vector<1x8x128xf32> to vector<8x128xf32>
    %7 = vector.shape_cast %4 : vector<8x128xf32> to vector<1x8x128xf32>
    %8 = vector.shape_cast %6 : vector<8x128xf32> to vector<1x8x128xf32>
    %c0_6 = arith.constant 0 : index
    %c0_7 = arith.constant 0 : index
    %9 = vector.load %arg5[%c0_6, %c0_7] : memref<8x128xf32, #tpu.memory_space<vmem>>, vector<8x128xf32>
    %10 = arith.mulf %8, %7 : vector<1x8x128xf32>
    %cst = arith.constant dense<0.000000e+00> : vector<8x128xf32>
    %11 = vector.multi_reduction <add>, %10, %cst [0] : vector<1x8x128xf32> to vector<8x128xf32>
    %12 = arith.addf %9, %11 : vector<8x128xf32>
    %c0_8 = arith.constant 0 : index
    %c0_9 = arith.constant 0 : index
    %13 = vector.load %arg5[%c0_8, %c0_9] : memref<8x128xf32, #tpu.memory_space<vmem>>, vector<8x128xf32>
    tpu.vector_store %arg5[%c0_8, %c0_9], %12 {strides = array<i32>} : memref<8x128xf32, #tpu.memory_space<vmem>>, vector<8x128xf32>,
    %c0_10 = arith.constant 0 : index
    %c0_11 = arith.constant 0 : index
    %14 = vector.load %arg6[%c0_10, %c0_11] : memref<8x128xf32, #tpu.memory_space<vmem>>, vector<8x128xf32>
    %cst_12 = arith.constant dense<0.000000e+00> : vector<8x128xf32>
    %15 = vector.multi_reduction <add>, %7, %cst_12 [0] : vector<1x8x128xf32> to vector<8x128xf32>
    %16 = arith.addf %14, %15 : vector<8x128xf32>
    %c0_13 = arith.constant 0 : index
    %c0_14 = arith.constant 0 : index
    %17 = vector.load %arg6[%c0_13, %c0_14] : memref<8x128xf32, #tpu.memory_space<vmem>>, vector<8x128xf32>
    tpu.vector_store %arg6[%c0_13, %c0_14], %16 {strides = array<i32>} : memref<8x128xf32, #tpu.memory_space<vmem>>, vector<8x128xf32>,
    %c0_15 = arith.constant 0 : index
    %c0_16 = arith.constant 0 : index
    %18 = vector.load %arg7[%c0_15, %c0_16] : memref<8x128xf32, #tpu.memory_space<vmem>>, vector<8x128xf32>
    %cst_17 = arith.constant dense<0.000000e+00> : vector<8x128xf32>
    %19 = vector.multi_reduction <add>, %8, %cst_17 [0] : vector<1x8x128xf32> to vector<8x128xf32>
    %20 = arith.addf %18, %19 : vector<8x128xf32>
    %c0_18 = arith.constant 0 : index
    %c0_19 = arith.constant 0 : index
    %21 = vector.load %arg7[%c0_18, %c0_19] : memref<8x128xf32, #tpu.memory_space<vmem>>, vector<8x128xf32>
    tpu.vector_store %arg7[%c0_18, %c0_19], %20 {strides = array<i32>} : memref<8x128xf32, #tpu.memory_space<vmem>>, vector<8x128xf32>,
    %c0_i32_20 = arith.constant 0 : i32
    %22 = arith.cmpi eq, %arg1, %c0_i32_20 : i32
    %23 = arith.extui %22 : i1 to i32
    %c0_i32_21 = arith.constant 0 : i32
    %24 = arith.cmpi ne, %23, %c0_i32_21 : i32
    scf.if %24 {
      %c0_22 = arith.constant 0 : index
      %c0_23 = arith.constant 0 : index
      %25 = vector.load %arg5[%c0_22, %c0_23] : memref<8x128xf32, #tpu.memory_space<vmem>>, vector<8x128xf32>
      %26 = vector.shape_cast %25 : vector<8x128xf32> to vector<1x8x128xf32>
      %cst_24 = arith.constant dense<0.000000e+00> : vector<1xf32>
      %27 = vector.multi_reduction <add>, %26, %cst_24 [1, 2] : vector<1x8x128xf32> to vector<1xf32>
      %28 = vector.shape_cast %27 : vector<1xf32> to vector<1x1x1xf32>
      %29 = vector.extract %28[0, 0, 0] : f32 from vector<1x1x1xf32>
      %c0_25 = arith.constant 0 : index
      %c0_26 = arith.constant 0 : index
      %30 = vector.load %arg6[%c0_25, %c0_26] : memref<8x128xf32, #tpu.memory_space<vmem>>, vector<8x128xf32>
      %31 = vector.shape_cast %30 : vector<8x128xf32> to vector<1x8x128xf32>
      %cst_27 = arith.constant dense<0.000000e+00> : vector<1xf32>
      %32 = vector.multi_reduction <add>, %31, %cst_27 [1, 2] : vector<1x8x128xf32> to vector<1xf32>
      %33 = vector.shape_cast %32 : vector<1xf32> to vector<1x1x1xf32>
      %34 = vector.extract %33[0, 0, 0] : f32 from vector<1x1x1xf32>
      %c0_28 = arith.constant 0 : index
      %c0_29 = arith.constant 0 : index
      %35 = vector.load %arg7[%c0_28, %c0_29] : memref<8x128xf32, #tpu.memory_space<vmem>>, vector<8x128xf32>
      %36 = vector.shape_cast %35 : vector<8x128xf32> to vector<1x8x128xf32>
      %cst_30 = arith.constant dense<0.000000e+00> : vector<1xf32>
      %37 = vector.multi_reduction <add>, %36, %cst_30 [1, 2] : vector<1x8x128xf32> to vector<1xf32>
      %38 = vector.shape_cast %37 : vector<1xf32> to vector<1x1x1xf32>
      %39 = vector.extract %38[0, 0, 0] : f32 from vector<1x1x1xf32>
      %cst_31 = arith.constant 2.000000e+00 : f32
      %40 = arith.mulf %cst_31, %29 : f32
      %cst_32 = arith.constant 9.99999974E-6 : f32
      %41 = arith.addf %40, %cst_32 : f32
      %42 = arith.addf %34, %39 : f32
      %cst_33 = arith.constant 9.99999974E-6 : f32
      %43 = arith.addf %42, %cst_33 : f32
      %44 = arith.divf %41, %43 : f32
      %45 = vector.broadcast %44 : f32 to vector<8x128xf32>
      %c0_34 = arith.constant 0 : index
      %c0_35 = arith.constant 0 : index
      %c0_36 = arith.constant 0 : index
      %46 = vector.load %arg4[%c0_34, %c0_35, %c0_36] : memref<1x8x128xf32, #tpu.memory_space<vmem>>, vector<1x8x128xf32>
      %47 = vector.shape_cast %46 : vector<1x8x128xf32> to vector<8x128xf32>
      %48 = vector.shape_cast %45 : vector<8x128xf32> to vector<1x8x128xf32>
      tpu.vector_store %arg4[%c0_34, %c0_35, %c0_36], %48 {strides = array<i32>} : memref<1x8x128xf32, #tpu.memory_space<vmem>>, vector<1x8x128xf32>,
    } else {
    }
    return
  }
  func.func @transform_0(%arg0: i32, %arg1: i32) -> (i32, i32, i32) {
    %c0_i32 = arith.constant 0 : i32
    %c0_i32_0 = arith.constant 0 : i32
    return %arg0, %arg1, %c0_i32 : i32, i32, i32
  }
  func.func @transform_1(%arg0: i32, %arg1: i32) -> (i32, i32, i32) {
    %c0_i32 = arith.constant 0 : i32
    %c0_i32_0 = arith.constant 0 : i32
    return %arg0, %arg1, %c0_i32 : i32, i32, i32
  }
  func.func @transform_2(%arg0: i32, %arg1: i32) -> (i32, i32, i32) {
    %c0_i32 = arith.constant 0 : i32
    %c0_i32_0 = arith.constant 0 : i32
    %c0_i32_1 = arith.constant 0 : i32
    return %arg0, %c0_i32, %c0_i32_0 : i32, i32, i32
  }
}

</mosaic_0001>

<bundles_post_ra>
// kernel: tpu_custom_call.1
= control target key start
LH: loop header
LB: loop body
LE: loop exit
PB: predicated region body
PF: predicated region fallthrough
CT: control target
= control target key end

     0   :  { %7 = vsyncpa [#allocation6], 0  ;;  %s880_s0 = inlined_call_operand.hbm [shape: f32[2,8,128], index: 0, kind: input, shape index: {}]   ;;  %s881_s1 = inlined_call_operand.hbm [shape: f32[2,8,128], index: 1, kind: input, shape index: {}]   ;;  %s882_s2 = inlined_call_operand.hbm [shape: f32[2,8,128], index: 2, kind: output, shape index: {}]  }
   0x1   :  { %9 = vsyncpa [#allocation6 + $0x1], 0 }
   0x2   :  { %10 = vsyncpa [#allocation9], 0 }
   0x3   :  { %12 = vsyncpa [#allocation9 + $0x1], 0 }
   0x4   :  { %13 = vsyncpa [#allocation7], 0 }
   0x5   :  { %15 = vsyncpa [#allocation7 + $0x1], 0  ;;  %s655_s9 = smov 0   ;;  %s657_s10 = smov 0  }
   0x6   :  { %s659_s11 = smov 0   ;;  %s661_s12 = smov 0  }
   0x7   :  { %s663_s13 = smov 0   ;;  %s665_s14 = smov 0  }
   0x8 LB: > { %s396_s15 = sadd.s32 4294967295, %s635_s14   ;;  %s397_s16 = sadd.s32 4294967294, %s635_s14   ;;  %s635_s14 = sphi %s665_s14, %s21_s14   ;;  %s631_s13 = sphi %s663_s13, %s902_s13   ;;  %s627_s12 = sphi %s661_s12, %s901_s12   ;;  %s623_s11 = sphi %s659_s11, %s900_s11   ;;  %s619_s10 = sphi %s657_s10, %s899_s10   ;;  %s615_s9 = sphi %s655_s9, %s898_s9  }
   0x9   : > { %s33_s17 = sadd.s32 1, %s631_s13  ;;  %s42_s18 = sadd.s32 1, %s623_s11 }
   0xa   : > { %p35_p0 = scmp.ge.s32.totalorder %s33_s17, 2  ;;  %p49_p1 = scmp.ne.s32.totalorder %s623_s11, %s619_s10 }
   0xb   : > { %p50_p2 = scmp.eq.s32.totalorder %s635_s14, 0  ;;  %p55_p3 = scmp.ne.s32.totalorder %s619_s10, %s615_s9 }
   0xc   : > { %s904_s17 = smov (%p35_p0, %s33_s17), 0  ;;  %p56_p5 = scmp.eq.s32.totalorder %s396_s15, 0 }
   0xd   : > { %p696_p4 = por %p50_p2, %p49_p1  ;;  %s37_s20 = ssub.s32 %s631_s13, %s904_s17 }
   0xe   : > { %p107_p6 = scmp.eq.s32.totalorder %s396_s15, 1  ;;  %p40_p7 = scmp.eq.s32.totalorder %s37_s20, 0 }
   0xf   : > { %p702_p8 = por %p56_p5, %p55_p3  ;;  %p113_p10 = scmp.eq.s32.totalorder %s397_s16, 1 }
  0x10   : > { %p706_p9 = por %p107_p6, %p49_p1  ;;  %p437_p13 = scmp.lt.s32.totalorder %s635_s14, 2 }
  0x11   : > { %s886_s21 = scalar_select %p702_p8, 1, 0 }
  0x12   : > { %s887_s22 = scalar_select %p706_p9, 1, 0 }
  0x13   : > { %s711_s23 = scalar_select %p40_p7, %s623_s11, %s42_s18  }
  0x14   : > { %p713_p11 = por %p113_p10, %p55_p3  ;;  %s720_s25 = sand.u32 1, %s623_s11  }
  0x15   : > { %s400_s26 = sshll.u32 %s720_s25, 3  ;;  %s401_s27 = sshll.u32 %s631_s13, 7 }
  0x16   : > { %s888_s24 = scalar_select %p713_p11, 1, 0 }
  0x17   : > { %s729_s30 = scalar_lea.hbm %s880_s0, %s401_s27  ;;  %s137_s3 = scalar_lea.vmem [#allocation5], %s400_s26 }
  0x18   : > { %s145_s4 = sshll.u32 %s137_s3, 4  ;;  %p737_p0 = pnand %p437_p13, %p696_p4  ;;  %s733_s4 = int_to_ptr.vmem [resolvable:$true] %s145_s4 }
  0x19   : > { %s134_s6 = scalar_lea.sflag [#allocation6], %s720_s25  ;;  %s489_s7 = scalar_lea.hbm %s729_s30, 128 }
  0x1a   : > { %p490_p3 = scmp.ne.s32.totalorder %s729_s30, %s489_s7  ;;  %p491_p5 = pneg %p737_p0 }
  0x1b   : > { %s494_s16 = scalar_lea.hbm %s880_s0, 256  ;;  %p495_p4 = scmp.lt.u32.totalorder %s729_s30, %s880_s0 }
  0x1c   : > { %p492_p6 = pnand %p491_p5, %p490_p3  ;;  %p496_p10 = scmp.lt.u32.totalorder %s494_s16, %s489_s7 }
  0x1d   : > { %p498_p12 = scmp.lt.u32.totalorder %s489_s7, %s729_s30 }
  0x1e   : > { %p493_p7 = pneg %p492_p6  ;;  %p497_p13 = por %p496_p10, %p495_p4 }
  0x20   : > { %p499_p1 = por %p498_p12, %p497_p13 }
  0x22   : > { %p500_p2 = pnand %p499_p1, %p493_p7 }
  0x24   : > { %503 = shalt.err (!%p500_p2)
}
  0x25   : > { %s504_s20 = scalar_lea.vmem %s733_s4, 128  ;;  %s637_s28 = smov [#allocation5]  }
  0x26   : > { %p505_p3 = scmp.ne.s32.totalorder %s733_s4, %s504_s20  ;;  %s509_s29 = sshll.u32 %s637_s28, 4  ;;  %s510_s29 = int_to_ptr.vmem [resolvable:$false] %s509_s29 }
  0x27   : > { %s511_s3 = scalar_lea.vmem %s510_s29, 256  ;;  %p512_p9 = scmp.lt.s32.totalorder %s733_s4, %s510_s29 }
  0x28   : > { %p507_p6 = pnand %p505_p3, %p491_p5  ;;  %p513_p4 = scmp.lt.s32.totalorder %s511_s3, %s504_s20 }
  0x2a   : > { %p508_p11 = pneg %p507_p6  ;;  %p514_p10 = por %p513_p4, %p512_p9 }
  0x2c   : > { %p515_p12 = pnand %p514_p10, %p508_p11 }
  0x2e   : > { %518 = shalt.err (!%p515_p12)
}
  0x2f   : > { %429 = dma.hbm_to_vmem [thread:$0]  (!%p737_p0), %s729_s30, 128, %s733_s4, %s134_s6  }
  0x30   : > { %p890_p1 = scmp.lt.s32.totalorder %s635_s14, 3  ;;  %p891_p2 = scmp.ge.s32.totalorder %s635_s14, 1 }
  0x31   : > { %s782_s16 = scalar_lea.hbm %s881_s1, %s401_s27  ;;  %s156_s18 = scalar_lea.vmem [#allocation8], %s400_s26 }
  0x32   : > { %p773_p7 = pnand %p891_p2, %p890_p1  ;;  %s164_s19 = sshll.u32 %s156_s18, 4  ;;  %s165_s19 = int_to_ptr.vmem [resolvable:$true] %s164_s19 }
  0x33   : > { %s153_s30 = scalar_lea.sflag [#allocation9], %s720_s25  ;;  %s519_s4 = scalar_lea.hbm %s782_s16, 128 }
  0x34   : > { %s892_s7 = scalar_select %p773_p7, 1, 0 }
  0x35   : > { %p520_p9 = scmp.ne.s32.totalorder %s782_s16, %s519_s4  ;;  %s524_s27 = scalar_lea.hbm %s881_s1, 256 }
  0x36   : > { %p525_p3 = scmp.lt.u32.totalorder %s782_s16, %s881_s1  ;;  %p526_p6 = scmp.lt.u32.totalorder %s524_s27, %s519_s4 }
  0x37   : > { %p522_p11 = pnand %p520_p9, %p491_p5  ;;  %p528_p10 = scmp.lt.u32.totalorder %s519_s4, %s782_s16 }
  0x38   : > { %p527_p4 = por %p526_p6, %p525_p3 }
  0x39   : > { %p523_p13 = pneg %p522_p11 }
  0x3a   : > { %p529_p12 = por %p528_p10, %p527_p4 }
  0x3c   : > { %p530_p1 = pnand %p529_p12, %p523_p13 }
  0x3e   : > { %533 = shalt.err (!%p530_p1)
}
  0x3f   : > { %s534_s25 = scalar_lea.vmem %s165_s19, 128  ;;  %s638_s26 = smov [#allocation8]  }
  0x40   : > { %p535_p2 = scmp.ne.s32.totalorder %s165_s19, %s534_s25  ;;  %s539_s3 = sshll.u32 %s638_s26, 4  ;;  %s540_s3 = int_to_ptr.vmem [resolvable:$false] %s539_s3 }
  0x41   : > { %s541_s8 = scalar_lea.vmem %s540_s3, 256  ;;  %p542_p8 = scmp.lt.s32.totalorder %s165_s19, %s540_s3 }
  0x42   : > { %p537_p9 = pnand %p535_p2, %p491_p5  ;;  %p543_p7 = scmp.lt.s32.totalorder %s541_s8, %s534_s25 }
  0x44   : > { %p538_p11 = pneg %p537_p9  ;;  %p544_p3 = por %p543_p7, %p542_p8 }
  0x46   : > { %p545_p6 = pnand %p544_p3, %p538_p11 }
  0x48   : > { %548 = shalt.err (!%p545_p6)
}
  0x49   : > { %432 = dma.hbm_to_vmem [thread:$0]  (!%p737_p0), %s782_s16, 128, %s165_s19, %s153_s30  }
  0x4a   : > { %p893_p13 = scmp.ne.s32.totalorder %s892_s7, 0 }
  0x4b   : > { %s809_s15 = sand.u32 (!%p893_p13), 1, %s619_s10   ;;  %p894_p8 = scmp.ne.s32.totalorder (!%p893_p13), %s886_s21, 0 }
  0x4c   : > { %173 = sbr.rel (%p893_p13) target bundleno = 381 (0x17d), region = 28  ;;  %s812_s18 = sshll.u32 (!%p893_p13), %s809_s15, 3 }
  0x4d   : > { %s176_s4 = scalar_lea.sflag (!%p893_p13), [#allocation6], %s809_s15  ;;  %s179_s6 = scalar_lea.vmem (!%p893_p13), [#allocation5], %s812_s18 }
  0x53   : > { %602 = dma.done.wait (%p894_p8), %s176_s4, 128  }
  0x54   : > { %604 = vsyncadd (%p894_p8), %s176_s4, 4294967168  ;;  %s185_s5 = scalar_lea.sflag [#allocation9], %s809_s15  ;;  %s188_s7 = scalar_lea.vmem [#allocation8], %s812_s18 }
  0x55   : > { %606 = dma.done.wait (%p894_p8), %s185_s5, 128  }
  0x56   : > { %608 = vsyncadd (%p894_p8), %s185_s5, 4294967168  ;;  %v222_v0 = vld [vmem:[%s188_s7] sm:$0xff]  ;;  %v221_v1 = vld [vmem:[%s179_s6] sm:$0xff]  ;;  %s409_s28 = sshll.u32 %s627_s12, 7  ;;  %s213_s25 = scalar_lea.vmem [#allocation10], %s812_s18 }
  0x57   : > { %260 = vadd.xlane.f32.xlu1 %v222_v0  ;;  %v224_v2 = vmul.f32 %v222_v0, %v221_v1  ;;  %s293_s26 = sshll.u32 %s213_s25, 4  ;;  %s831_s5 = scalar_lea.hbm %s882_s2, %s409_s28  ;;  %s833_s26 = int_to_ptr.vmem [resolvable:$true] %s293_s26 }
  0x58   : > { %s280_s7 = scalar_lea.sflag [#allocation7], %s809_s15  ;;  %p895_p5 = scmp.ne.s32.totalorder %s887_s22, 0 }
  0x59   : > { %240 = vadd.xlane.f32.xlu0 %v224_v2  ;;  %s639_s12 = smov [#allocation10]  }
  0x5a   : > { %s553_s18 = sshll.u32 %s639_s12, 4  ;;  %s554_s18 = int_to_ptr.vmem [resolvable:$false] %s553_s18 }
  0x5b   : > { %p556_p10 = scmp.lt.s32.totalorder %s833_s26, %s554_s18 }
  0x5d   : > { %250 = vadd.xlane.f32.xlu0 %v221_v1 }
  0xe4   : > { %v261_v3 = vpop.xlane.xlu1 %260 }
  0xe5   : > { %v262_v4 = vrot.slane %v261_v3, 4 }
  0xe6   : > { %v241_v5 = vpop.xlane.xlu0 %240 }
  0xe7   : > { %v263_v6 = vadd.f32 %v262_v4, %v261_v3  ;;  %v242_v7 = vrot.slane %v241_v5, 4 }
  0xe9   : > { %v243_v8 = vadd.f32 %v242_v7, %v241_v5  ;;  %v264_v9 = vrot.slane %v263_v6, 2 }
  0xea   : > { %v251_v10 = vpop.xlane.xlu0 %250 }
  0xeb   : > { %v244_v11 = vrot.slane %v243_v8, 2  ;;  %v252_v12 = vrot.slane %v251_v10, 4  ;;  %v265_v15 = vadd.f32 %v264_v9, %v263_v6 }
  0xed   : > { %v253_v13 = vadd.f32 %v252_v12, %v251_v10  ;;  %v245_v14 = vadd.f32 %v244_v11, %v243_v8  ;;  %v266_v20 = vrot.slane %v265_v15, 1 }
  0xef   : > { %v254_v16 = vrot.slane %v253_v13, 2  ;;  %v246_v17 = vrot.slane %v245_v14, 1  ;;  %v267_v23 = vadd.f32 %v266_v20, %v265_v15 }
  0xf1   : > { %v255_v18 = vadd.f32 %v254_v16, %v253_v13  ;;  %v247_v19 = vadd.f32 %v246_v17, %v245_v14 }
  0xf3   : > { %412 = vpush %v247_v19  ;;  %v256_v21 = vrot.slane %v255_v18, 1 }
  0xf5   : > { %v257_v22 = vadd.f32 %v256_v21, %v255_v18 }
  0xf7   : > { %414 = vpush %v257_v22 }
  0xf8   : > { %416 = vpush %v267_v23 }
 0x124   : > { %s413_s21 = spop %412 }
 0x125   : > { %s269_s27 = smul.f32 2.0, %s413_s21  ;;  %s549_s21 = scalar_lea.vmem %s833_s26, 128 }
 0x126   : > { %p550_p0 = scmp.ne.s32.totalorder %s833_s26, %s549_s21 }
 0x127   : > { %s270_s29 = sadd.f32 1e-05, %s269_s27 }
 0x128   : > { %s415_s16 = spop %414  ;;  %p551_p7 = pnand %p550_p0, %p895_p5 }
 0x129   : > { %s417_s19 = spop %416 }
 0x12a   : > { %s271_s30 = sadd.f32 %s417_s19, %s415_s16  ;;  %p552_p4 = pneg %p551_p7 }
 0x12b   : > { %s555_s16 = scalar_lea.vmem %s554_s18, 256 }
 0x12c   : > { %s272_s20 = sadd.f32 1e-05, %s271_s30  ;;  %p557_p12 = scmp.lt.s32.totalorder %s555_s16, %s549_s21 }
 0x12e   : > { %v273_v24 = vstv %s272_s20  ;;  %p558_p1 = por %p557_p12, %p556_p10 }
 0x12f   : > { %487 = vrcp.f32 %v273_v24 }
 0x130   : > { %p559_p2 = pnand %p558_p1, %p552_p4 }
 0x139   : > { %v488_v25 = vpop.eup %487 }
 0x13a   : > { %418 = vpush %v488_v25 }
 0x16b   : > { %s419_s3 = spop %418 }
 0x16c   : > { %s276_s8 = smul.f32 %s419_s3, %s270_s29 }
 0x16e   : > { %v277_v26 = vstv %s276_s8 }
 0x16f   : > { %278 = vst [vmem:[%s213_s25] sm:$0xff] %v277_v26 }
 0x170   : > { %562 = shalt.err (!%p559_p2)
}
 0x171   : > { %s563_s15 = scalar_lea.hbm %s831_s5, 128  ;;  %s567_s20 = scalar_lea.hbm %s882_s2, 256 }
 0x172   : > { %p564_p9 = scmp.ne.s32.totalorder %s831_s5, %s563_s15  ;;  %p568_p6 = scmp.lt.u32.totalorder %s831_s5, %s882_s2 }
 0x173   : > { %p569_p13 = scmp.lt.u32.totalorder %s567_s20, %s563_s15  ;;  %p571_p0 = scmp.lt.u32.totalorder %s563_s15, %s831_s5 }
 0x174   : > { %p565_p11 = pnand %p564_p9, %p895_p5 }
 0x175   : > { %p570_p8 = por %p569_p13, %p568_p6 }
 0x176   : > { %p566_p3 = pneg %p565_p11 }
 0x177   : > { %p572_p7 = por %p571_p0, %p570_p8 }
 0x179   : > { %p573_p4 = pnand %p572_p7, %p566_p3 }
 0x17b   : > { %576 = shalt.err (!%p573_p4)
}
 0x17c   : > { %424 = dma.vmem_to_hbm [thread:$0]  (%p895_p5), %s833_s26, 128, %s831_s5, %s280_s7  }
 0x17d PF: > { %s305_s29 = sand.u32 1, %s615_s9   ;;  %p896_p10 = scmp.ne.s32.totalorder %s888_s24, 0 }
 0x17e   : > { %p897_p12 = scmp.ge.s32.totalorder %s635_s14, 2  ;;  %s306_s25 = scalar_lea.sflag [#allocation7], %s305_s29 }
 0x180   : > { %p434_p1 = pnand %p897_p12, %p896_p10 }
 0x182   : > { %610 = dma.done.wait (!%p434_p1), %s306_s25, 128  }
 0x183   : > { %612 = vsyncadd (!%p434_p1), %s306_s25, 4294967168  ;;  %s21_s14 = sadd.s32 1, %s635_s14   ;;  %s898_s9 = smov %s619_s10 }
 0x184   : > { %p18_p2 = scmp.ge.s32.totalorder %s21_s14, 4   ;;  %s899_s10 = smov %s623_s11 }
 0x185   : > { %s900_s11 = smov %s711_s23  ;;  %s901_s12 = smov %s631_s13 }
 0x186   : > { %s902_s13 = smov %s904_s17  ;;  %20 = sbr.rel (!%p18_p2) target bundleno = 8 (0x8), region = 94 }
 0x18d   :  { %311 = vsyncpa [#allocation6], 1 }
 0x18e   :  { %313 = vsyncpa [#allocation6 + $0x1], 1 }
 0x18f   :  { %314 = vsyncpa [#allocation9], 1 }
 0x190   :  { %316 = vsyncpa [#allocation9 + $0x1], 1 }
 0x191   :  { %317 = vsyncpa [#allocation7], 1 }
 0x192   :  { %319 = vsyncpa [#allocation7 + $0x1], 1 }

</bundles_post_ra>
